<compile_context>
chip_gen: v7x
topology: tpu7x:2x2x1
jax: 0.10.0
libtpu: 0.0.40
codegen_flags: <defaults>
</compile_context>

<pallas_src>
import functools
import math

import jax
import jax.numpy as jnp
from jax import lax
from jax.experimental import pallas as pl
from jax.experimental.pallas import tpu as pltpu


def _mlp_kernel(x_ref, w1_ref, b1_ref, w2_ref, b2_ref, o_ref):
    # x_ref: (bm, dim) natural-layout tile.  Weights in PyTorch (out, in) layout.
    x = x_ref[...].astype(jnp.float32)          # (bm, dim)
    w1 = w1_ref[...].astype(jnp.float32)        # (hidden, dim)
    w2 = w2_ref[...].astype(jnp.float32)        # (dim, hidden)

    # h^T = W1 @ x^T  (contract the shared `dim` axis; MXU N dim = bm, lane-dense).
    h = lax.dot_general(w1, x, (((1,), (1,)), ((), ())),
                        preferred_element_type=jnp.float32)
    h = h + b1_ref[...]                         # (hidden, bm) + (hidden, 1)

    # Exact (erf-based) GELU on the lane-dense intermediate, f32 math.
    inv_sqrt2 = jnp.float32(1.0 / math.sqrt(2.0))
    h = 0.5 * h * (1.0 + lax.erf(h * inv_sqrt2))

    # o^T = W2 @ GELU(h^T) + b2  -> (dim, bm), still lane-dense for the MXU.
    oT = jnp.dot(w2, h, preferred_element_type=jnp.float32) + b2_ref[...]

    # Single in-kernel transpose (XLU slot, idle under the DMA-bound loop) back
    # to the natural (bm, dim) layout; the dim=32-lane store is masked but the
    # HBM writeback stays contiguous and we avoid any host-side transpose pass.
    o_ref[...] = oT.T.astype(o_ref.dtype)


@functools.partial(jax.jit,
                   static_argnames=("block_m", "min_pallas_m", "force_pallas"))
def spectral_attention(x, w1, b1, w2, b2, *, block_m=4096, min_pallas_m=1024,
                       force_pallas=False):
    """x: (B, S, dim) -> (B, S, dim).

    w1: (hidden, dim), b1: (hidden,), w2: (dim, hidden), b2: (dim,)
    (PyTorch nn.Linear layout: weight (out_features, in_features)).
    """
    B, S, dim = x.shape
    hidden = w1.shape[0]
    M = B * S
    x2d = x.reshape(M, dim)                     # free reshape, no data movement

    # Small-M fallback: at these sizes the custom call is pure launch overhead.
    if M < min_pallas_m and not force_pallas:
        h = x2d @ w1.T + b1
        h = 0.5 * h * (1.0 + lax.erf(h * jnp.float32(1.0 / math.sqrt(2.0))))
        return (h @ w2.T + b2).reshape(B, S, dim).astype(x.dtype)

    # Row-tile size: multiple of 128 (or the full extent).  Large tiles amortize
    # the ~0.35us per-grid-step overhead.
    if block_m >= M:
        bm = M
    else:
        bm = max(128, (block_m // 128) * 128)
    # v7x megacore: keep the "parallel" grid at >= 4 steps so both TensorCores
    # get work, as long as tiles stay >= 1024 rows (still DMA-bound per step).
    # Harmless on single-TC v5e/v6e.
    if M >= 4 * 1024 and M // bm < 4:
        bm = max(1024, ((M // 4) // 128) * 128)
    grid = (pl.cdiv(M, bm),)

    b1_col = b1.reshape(hidden, 1)
    b2_col = b2.reshape(dim, 1)

    # VMEM budget from actual sizes: double-buffered x/out tiles + (grid-
    # invariant, revisit-optimized) weights + f32 in-kernel intermediates.
    itemsize = jnp.dtype(x.dtype).itemsize
    p_itemsize = jnp.dtype(w1.dtype).itemsize
    tile_bytes = bm * dim * itemsize
    weight_bytes = (hidden * dim + hidden + dim * hidden + dim) * p_itemsize
    compute_bytes = bm * (hidden + 2 * dim) * 4
    vmem_need = 2 * (2 * tile_bytes) + 2 * weight_bytes + compute_bytes
    vmem_limit = int(min(32 * 1024 * 1024, max(16 * 1024 * 1024, 2 * vmem_need)))

    cost = pl.CostEstimate(
        flops=4 * M * dim * hidden,
        transcendentals=M * hidden,
        bytes_accessed=itemsize * 2 * M * dim + weight_bytes,
    )

    out2d = pl.pallas_call(
        _mlp_kernel,
        out_shape=jax.ShapeDtypeStruct((M, dim), x.dtype),
        grid_spec=pl.GridSpec(
            grid=grid,
            in_specs=[
                pl.BlockSpec((bm, dim), lambda i: (i, 0)),      # x tile (natural layout)
                # Grid-invariant weights/biases: constant index_map, so Pallas's
                # revisit optimization skips per-step re-DMA of these tiny blocks.
                pl.BlockSpec((hidden, dim), lambda i: (0, 0)),  # W1
                pl.BlockSpec((hidden, 1), lambda i: (0, 0)),    # b1
                pl.BlockSpec((dim, hidden), lambda i: (0, 0)),  # W2
                pl.BlockSpec((dim, 1), lambda i: (0, 0)),       # b2
            ],
            out_specs=pl.BlockSpec((bm, dim), lambda i: (i, 0)),
        ),
        compiler_params=pltpu.CompilerParams(
            dimension_semantics=("parallel",),
            vmem_limit_bytes=vmem_limit,
        ),
        cost_estimate=cost,
    )(x2d, w1, b1_col, w2, b2_col)

    return out2d.reshape(B, S, dim)


def _reference(x, w1, b1, w2, b2):
    # Pure-JAX reference mirroring nn.Linear (y = x @ W^T + b) + exact GELU.
    h = jnp.einsum("bsd,hd->bsh", x, w1) + b1
    h = 0.5 * h * (1.0 + lax.erf(h / jnp.sqrt(2.0)))
    return jnp.einsum("bsh,dh->bsd", h, w2) + b2


if __name__ == "__main__":
    # Small shapes consistent with the module: batch=2, seq=8, dim=32.
    B, S, dim = 2, 8, 32
    hidden = dim // 2

    key = jax.random.PRNGKey(0)
    kx, k1, k2, k3, k4, kx2 = jax.random.split(key, 6)

    # Deterministic parameter init (uniform, ~PyTorch Linear fan-in scaling),
    # stored in PyTorch (out_features, in_features) layout.
    bound1 = 1.0 / math.sqrt(dim)
    bound2 = 1.0 / math.sqrt(hidden)
    w1 = jax.random.uniform(k1, (hidden, dim), jnp.float32, -bound1, bound1)
    b1 = jax.random.uniform(k2, (hidden,), jnp.float32, -bound1, bound1)
    w2 = jax.random.uniform(k3, (dim, hidden), jnp.float32, -bound2, bound2)
    b2 = jax.random.uniform(k4, (dim,), jnp.float32, -bound2, bound2)

    # 1) Tiny shape: force the Pallas path (single block).
    x = jax.random.normal(kx, (B, S, dim), dtype=jnp.float32)
    out = jax.block_until_ready(
        spectral_attention(x, w1, b1, w2, b2, force_pallas=True))
    ref = _reference(x, w1, b1, w2, b2)
    assert out.shape == (B, S, dim)
    assert jnp.allclose(out, ref, atol=1e-5, rtol=1e-5), "mismatch vs reference"

    # 2) Multi-block path with a ragged last tile (M=1408, bm=512 -> grid=3).
    x2 = jax.random.normal(kx2, (2, 704, dim), dtype=jnp.float32)
    out2 = jax.block_until_ready(
        spectral_attention(x2, w1, b1, w2, b2, block_m=512, force_pallas=True))
    ref2 = _reference(x2, w1, b1, w2, b2)
    assert jnp.allclose(out2, ref2, atol=1e-5, rtol=1e-5), "mismatch (multi-block)"

    print("KERNEL_OK")
</pallas_src>

<mosaic_0001>
module attributes {stable_mosaic.version = 11 : i64} {
  func.func @_mlp_kernel(%arg0: i32, %arg1: memref<16x32xf32, #tpu.memory_space<vmem>>, %arg2: memref<16x32xf32, #tpu.memory_space<vmem>>, %arg3: memref<16x1xf32, #tpu.memory_space<vmem>>, %arg4: memref<32x16xf32, #tpu.memory_space<vmem>>, %arg5: memref<32x1xf32, #tpu.memory_space<vmem>>, %arg6: memref<16x32xf32, #tpu.memory_space<vmem>>) attributes {dimension_semantics = [#tpu.dimension_semantics<parallel>], iteration_bounds = array<i64: 1>, scalar_prefetch = 0 : i64, scratch_operands = 0 : i64, tpu.core_type = #tpu.core_type<tc>, window_params = [{transform_indices = @transform_0, window_bounds = array<i64: 16, 32>}, {pipeline_mode = #tpu.pipeline_mode<synchronous>, transform_indices = @transform_1, window_bounds = array<i64: 16, 32>}, {pipeline_mode = #tpu.pipeline_mode<synchronous>, transform_indices = @transform_2, window_bounds = array<i64: 16, 1>}, {pipeline_mode = #tpu.pipeline_mode<synchronous>, transform_indices = @transform_3, window_bounds = array<i64: 32, 16>}, {pipeline_mode = #tpu.pipeline_mode<synchronous>, transform_indices = @transform_4, window_bounds = array<i64: 32, 1>}, {transform_indices = @transform_5, window_bounds = array<i64: 16, 32>}]} {
    %c0 = arith.constant 0 : index
    %c0_0 = arith.constant 0 : index
    %0 = vector.load %arg1[%c0, %c0_0] : memref<16x32xf32, #tpu.memory_space<vmem>>, vector<16x32xf32>
    %c0_1 = arith.constant 0 : index
    %c0_2 = arith.constant 0 : index
    %1 = vector.load %arg2[%c0_1, %c0_2] : memref<16x32xf32, #tpu.memory_space<vmem>>, vector<16x32xf32>
    %c0_3 = arith.constant 0 : index
    %c0_4 = arith.constant 0 : index
    %2 = vector.load %arg4[%c0_3, %c0_4] : memref<32x16xf32, #tpu.memory_space<vmem>>, vector<32x16xf32>
    %cst = arith.constant dense<0.000000e+00> : vector<16x16xf32>
    %3 = tpu.matmul %1, %0, %cst {dimension_numbers = #tpu.dot_dimension_numbers<[1], [1], [0], [0], [0, 0, 1, 0], [], []>} : vector<16x32xf32>, vector<16x32xf32>, vector<16x16xf32> -> vector<16x16xf32>
    %c0_5 = arith.constant 0 : index
    %c0_6 = arith.constant 0 : index
    %4 = vector.load %arg3[%c0_5, %c0_6] : memref<16x1xf32, #tpu.memory_space<vmem>>, vector<16x1xf32>
    %5 = vector.broadcast %4 : vector<16x1xf32> to vector<16x16xf32>
    %6 = arith.addf %3, %5 : vector<16x16xf32>
    %cst_7 = arith.constant 5.000000e-01 : f32
    %7 = vector.broadcast %cst_7 : f32 to vector<16x16xf32>
    %8 = arith.mulf %7, %6 : vector<16x16xf32>
    %cst_8 = arith.constant 0.707106769 : f32
    %9 = vector.broadcast %cst_8 : f32 to vector<16x16xf32>
    %10 = arith.mulf %6, %9 : vector<16x16xf32>
    %11 = math.erf %10 : vector<16x16xf32>
    %cst_9 = arith.constant 1.000000e+00 : f32
    %12 = vector.broadcast %cst_9 : f32 to vector<16x16xf32>
    %13 = arith.addf %12, %11 : vector<16x16xf32>
    %14 = arith.mulf %8, %13 : vector<16x16xf32>
    %cst_10 = arith.constant dense<0.000000e+00> : vector<32x16xf32>
    %15 = tpu.matmul %2, %14, %cst_10 {dimension_numbers = #tpu.dot_dimension_numbers<[1], [0], [0], [1], [0, 0, 1, 1], [], []>} : vector<32x16xf32>, vector<16x16xf32>, vector<32x16xf32> -> vector<32x16xf32>
    %c0_11 = arith.constant 0 : index
    %c0_12 = arith.constant 0 : index
    %16 = vector.load %arg5[%c0_11, %c0_12] : memref<32x1xf32, #tpu.memory_space<vmem>>, vector<32x1xf32>
    %17 = vector.broadcast %16 : vector<32x1xf32> to vector<32x16xf32>
    %18 = arith.addf %15, %17 : vector<32x16xf32>
    %19 = tpu.transpose %18, [1, 0] : vector<32x16xf32> -> vector<16x32xf32>
    %c0_13 = arith.constant 0 : index
    %c0_14 = arith.constant 0 : index
    %20 = vector.load %arg6[%c0_13, %c0_14] : memref<16x32xf32, #tpu.memory_space<vmem>>, vector<16x32xf32>
    tpu.vector_store %arg6[%c0_13, %c0_14], %19 {strides = array<i32>} : memref<16x32xf32, #tpu.memory_space<vmem>>, vector<16x32xf32>,
    return
  }
  func.func @transform_0(%arg0: i32) -> (i32, i32) {
    %c0_i32 = arith.constant 0 : i32
    %c0_i32_0 = arith.constant 0 : i32
    return %arg0, %c0_i32 : i32, i32
  }
  func.func @transform_1(%arg0: i32) -> (i32, i32) {
    %c0_i32 = arith.constant 0 : i32
    %c0_i32_0 = arith.constant 0 : i32
    %c0_i32_1 = arith.constant 0 : i32
    return %c0_i32, %c0_i32_0 : i32, i32
  }
  func.func @transform_2(%arg0: i32) -> (i32, i32) {
    %c0_i32 = arith.constant 0 : i32
    %c0_i32_0 = arith.constant 0 : i32
    %c0_i32_1 = arith.constant 0 : i32
    return %c0_i32, %c0_i32_0 : i32, i32
  }
  func.func @transform_3(%arg0: i32) -> (i32, i32) {
    %c0_i32 = arith.constant 0 : i32
    %c0_i32_0 = arith.constant 0 : i32
    %c0_i32_1 = arith.constant 0 : i32
    return %c0_i32, %c0_i32_0 : i32, i32
  }
  func.func @transform_4(%arg0: i32) -> (i32, i32) {
    %c0_i32 = arith.constant 0 : i32
    %c0_i32_0 = arith.constant 0 : i32
    %c0_i32_1 = arith.constant 0 : i32
    return %c0_i32, %c0_i32_0 : i32, i32
  }
  func.func @transform_5(%arg0: i32) -> (i32, i32) {
    %c0_i32 = arith.constant 0 : i32
    %c0_i32_0 = arith.constant 0 : i32
    return %arg0, %c0_i32 : i32, i32
  }
}

</mosaic_0001>

<bundles_post_ra>
// kernel: spectral_attention.1
= control target key start
LH: loop header
LB: loop body
LE: loop exit
PB: predicated region body
PF: predicated region fallthrough
CT: control target
= control target key end

     0   :  { %vm41_vm0 = vcmask 261120   ;;  %v391_v4 = vmov 0   ;;  %s489_s0 = inlined_call_operand.vmem [shape: f32[16,32], index: 0, kind: input, shape index: {}]   ;;  %s490_s1 = inlined_call_operand.vmem [shape: f32[16,32], index: 1, kind: input, shape index: {}]   ;;  %s491_s2 = inlined_call_operand.vmem [shape: f32[16,1], index: 2, kind: input, shape index: {}]   ;;  %s492_s3 = inlined_call_operand.vmem [shape: f32[32,16], index: 3, kind: input, shape index: {}]   ;;  %s493_s4 = inlined_call_operand.vmem [shape: f32[32,1], index: 4, kind: input, shape index: {}]   ;;  %s494_s5 = inlined_call_operand.hbm [shape: f32[16,32], index: 5, kind: output, shape index: {}]  }
   0x1   :  { %v21_v0 = vld [vmem:[%s489_s0] sm:$0xff]  ;;  %v22_v1 = vld [vmem:[%s489_s0 + $0x8] sm:$0xff]  ;;  %vm347_vm1 = vmpackc.low %vm41_vm0, %vm41_vm0  ;;  %361 = vset.pattern.permute.xlu0 %v391_v4  ;;  %362 = vset.pattern.permute.xlu1 %v391_v4 }
   0x2   :  { %v23_v2 = vld [vmem:[%s490_s1] sm:$0xff]  ;;  %v346_v3 = vpack.c.bf16 %v22_v1, %v21_v0 }
   0x3   :  { %333 = vmatprep.mubr.msk.f32.mxu0 %vm41_vm0, %v23_v2  ;;  %v29_v5 = vld [vmem:[%s491_s2] sm:$0xff] }
   0x4   :  { %33 = vperm.xlu0 %361, %v29_v5  }
   0x5   :  { %10 = vsyncpa [#allocation3], 0  ;;  %348 = vmatprep.subr.msk.bf16.mxu0 %vm347_vm1, %v346_v3  ;;  %v30_v6 = vld [vmem:[%s491_s2 + $0x8] sm:$0xff]  ;;  %v141_v7 = vld [vmem:[%s493_s4 + $0x10] sm:$0xff]  ;;  %vm163_vm2 = vcmask 130048   ;;  %s392_s17 = smov [#allocation2]  }
   0x6   :  { %351 = vmatpush3.bf16.xpose.msk.msra.mxu0 %vm347_vm1, %v346_v3  ;;  %v24_v8 = vld [vmem:[%s490_s1 + $0x8] sm:$0xff]  ;;  %v25_v9 = vld [vmem:[%s492_s3] sm:$0xff]  ;;  %v142_v12 = vld [vmem:[%s493_s4 + $0x18] sm:$0xff] }
   0x7   :  { %340 = vmatprep.mubr.msk.f32.mxu1 %vm163_vm2, %v25_v9  ;;  %v139_v10 = vld [vmem:[%s493_s4] sm:$0xff]  ;;  %v140_v11 = vld [vmem:[%s493_s4 + $0x8] sm:$0xff]  ;;  %v27_v31 = vld [vmem:[%s492_s3 + $0x10] sm:$0xff] }
   0x8   :  { %38 = vperm.xlu0 %361, %v30_v6   ;;  %145 = vperm.xlu1 %362, %v139_v10   ;;  %v26_v30 = vld [vmem:[%s492_s3 + $0x8] sm:$0xff]  ;;  %v28_v32 = vld [vmem:[%s492_s3 + $0x18] sm:$0xff]  ;;  %s300_s3 = sshll.u32 %s392_s17, 4  ;;  %s301_s3 = int_to_ptr.vmem [resolvable:$true] %s300_s3 }
   0x9   :  { %s367_s18 = scalar_lea.vmem %s301_s3, 256  ;;  %p372_p1 = scmp.lt.s32.totalorder %s301_s3, %s301_s3 }
   0xa   :  { %p368_p0 = scmp.ne.s32.totalorder %s301_s3, %s367_s18  ;;  %p373_p2 = scmp.lt.s32.totalorder %s367_s18, %s367_s18 }
   0xc   :  { %155 = vperm.xlu0 %361, %v141_v7   ;;  %150 = vperm.xlu1 %362, %v140_v11   ;;  %p374_p3 = por %p373_p2, %p372_p1 }
   0xd   :  { %334 = vmatmul.mubr.msk.f32.vlgmr.msra.gmra.mrb[0].mxu0 %vm41_vm0, %v24_v8 }
   0xe   :  { %p375_p4 = pnand %p374_p3, %p368_p0 }
  0x10   :  { %160 = vperm.xlu1 %362, %v142_v12  }
  0x83   :  { %v34_v13 = vpop.permute.xlu0 %33 }
  0x87   :  { %v39_v14 = vpop.permute.xlu0 %38  ;;  %v146_v33 = vpop.permute.xlu1 %145 }
  0x8b   :  { %v151_v38 = vpop.permute.xlu1 %150  ;;  %v156_v41 = vpop.permute.xlu0 %155 }
  0x8f   :  { %v161_v43 = vpop.permute.xlu1 %160 }
  0xe0   :  { %v335_v15 = vpop.f32.mrb[0].mxu0 }
  0xe1   :  { %v126_v16 = vadd.f32 %v335_v15, %v39_v14  ;;  %v120_v17 = vpop.f32.mrb[1].mxu0 }
  0xe2   :  { %v121_v18 = vadd.f32 %v120_v17, %v34_v13 }
  0xe3   :  { %v132_v19 = vmul.f32 0.70710677, %v126_v16  ;;  %v130_v23 = vmul.f32 0.5, %v126_v16 }
  0xe4   :  { %v131_v20 = vmul.f32 0.70710677, %v121_v18  ;;  %v129_v25 = vmul.f32 0.5, %v121_v18 }
  0xe5   :  { %363 = verf.f32 %v132_v19 }
  0xe6   :  { %365 = verf.f32 %v131_v20 }
  0xef   :  { %v364_v21 = vpop.eup %363 }
  0xf0   :  { %v366_v22 = vpop.eup %365  ;;  %v136_v24 = vadd.f32 1.0, %v364_v21 }
  0xf1   :  { %v135_v26 = vadd.f32 1.0, %v366_v22 }
  0xf2   :  { %v138_v27 = vmul.f32 %v136_v24, %v130_v23 }
  0xf3   :  { %v137_v28 = vmul.f32 %v135_v26, %v129_v25 }
  0xf5   :  { %v352_v29 = vpack.c.bf16 %v138_v27, %v137_v28 }
  0xf7   :  { %353 = vmatprep.subr.bf16.mxu1 %v352_v29 }
  0xf8   :  { %355 = vmatpush3.bf16.msra.mxu1 %v352_v29 }
  0xfb   :  { %341 = vmatmul.mubr.msk.f32.vlgmr.msra.gmra.mrb[0].mxu1 %vm163_vm2, %v26_v30 }
  0xfc   :  { %343 = vmatprep.mubr.msk.f32.mxu1 %vm163_vm2, %v27_v31 }
  0xff   :  { %344 = vmatmul.mubr.msk.f32.gmra.mrb[2].mxu1 %vm163_vm2, %v28_v32 }
 0x1ce   :  { %v342_v34 = vpop.f32.mrb[0].mxu1 }
 0x1cf   :  { %v242_v35 = vpop.f32.mrb[1].mxu1  ;;  %v248_v40 = vadd.f32 %v342_v34, %v151_v38 }
 0x1d0   :  { %v243_v36 = vadd.f32 %v242_v35, %v146_v33 }
 0x1d2   :  { %v345_v37 = vpop.f32.mrb[2].mxu1  ;;  %261 = vxpose.xlu0.b32.start [1/4] (short) (narrow) %v243_v36, 16 }
 0x1d3   :  { %v252_v39 = vpop.f32.mrb[3].mxu1  ;;  %v258_v44 = vadd.f32 %v345_v37, %v161_v43 }
 0x1d4   :  { %v253_v42 = vadd.f32 %v252_v39, %v156_v41 }
 0x1d6   :  { %262 = vxpose.xlu0.b32.cont [2/4] (short) (narrow) %v248_v40, 16 }
 0x1da   :  { %263 = vxpose.xlu0.b32.cont [3/4] (short) (narrow) %v253_v42, 16 }
 0x1de   :  { %264 = vxpose.xlu0.b32.end [4/4] (short) (narrow) %v258_v44, 16 }
 0x252   :  { %v277_v45 = vpop.trf.xlu0 }
 0x253   :  { %293 = vst.msk [vmem:[#allocation2] sm:$0xff] %vm41_vm0, %v277_v45 }
 0x256   :  { %v278_v46 = vpop.trf.xlu0 }
 0x257   :  { %294 = vst.msk [vmem:[#allocation2 + $0x8] sm:$0xff] %vm41_vm0, %v278_v46 }
 0x258   :  { %378 = shalt.err (!%p375_p4)
}
 0x259   :  { %s379_s21 = scalar_lea.hbm %s494_s5, 256 }
 0x25a   :  { %p380_p5 = scmp.ne.s32.totalorder %s494_s5, %s379_s21  ;;  %p383_p6 = scmp.lt.u32.totalorder %s379_s21, %s494_s5 }
 0x25c   :  { %p385_p7 = pnand %p383_p6, %p380_p5 }
 0x25e   :  { %388 = shalt.err (!%p385_p7)
}
 0x25f   :  { %s393_s0 = smov 128   ;;  %s394_s26 = smov 8  }
 0x260   :  { %306 = dma.vmem_to_hbm [thread:$0]  %s301_s3, 256, %s494_s5, [#allocation3], %s393_s0, %s393_s0, %s394_s26  }
 0x261   :  { %389 = dma.done.wait [#allocation3], 256  }
 0x262   :  { %390 = vsyncadd [#allocation3], 4294967040 }
 0x263   :  { %310 = vsyncpa [#allocation3], 1 }

</bundles_post_ra>
